<compile_context>
chip_gen: v7x
topology: tpu7x:2x2x1
jax: 0.10.0
libtpu: 0.0.40
codegen_flags: <defaults>
</compile_context>

<pallas_src>
import functools

import jax
import jax.numpy as jnp
from jax import lax
from jax.experimental import pallas as pl
from jax.experimental.pallas import tpu as pltpu


def _round_up(v, m):
    return (v + m - 1) // m * m


def _vmem_capacity_bytes():
    """Physical VMEM per core; conservative (v7x-sized) fallback if unavailable."""
    try:
        cap = int(pltpu.get_tpu_info().vmem_capacity_bytes)
        if cap > 0:
            return cap
    except Exception:
        pass
    return 64 * 1024 * 1024


def _layernorm_f32(xf, g, b, eps):
    mean = jnp.mean(xf, axis=-1, keepdims=True)
    diff = xf - mean
    var = jnp.mean(diff * diff, axis=-1, keepdims=True)
    return diff * lax.rsqrt(var + eps) * g + b


def _mxu_dot(xop, wop, mxu_bf16):
    """MXU matmul with f32 accumulation; optionally narrow f32 operands to bf16."""
    if mxu_bf16 and xop.dtype == jnp.float32:
        xop = xop.astype(jnp.bfloat16)
    if wop.dtype != xop.dtype:
        wop = wop.astype(xop.dtype)
    return jnp.dot(xop, wop, preferred_element_type=jnp.float32)


def _kernel_nonorm(x_ref, wt_ref, b_ref, o_ref, *, mxu_bf16):
    """relu(x @ Wt + b). Used for both the resident and streamed layouts."""
    y = _mxu_dot(x_ref[...], wt_ref[...], mxu_bf16)
    y = y + b_ref[...].astype(jnp.float32)
    o_ref[...] = jnp.maximum(y, 0.0).astype(o_ref.dtype)


def _kernel_norm_resident(x_ref, wt_ref, b_ref, g_ref, beta_ref, o_ref, *, eps, mxu_bf16):
    """LayerNorm (f32 math) -> matmul -> bias -> ReLU; full out_len per row tile."""
    xn = _layernorm_f32(x_ref[...].astype(jnp.float32),
                        g_ref[...].astype(jnp.float32),
                        beta_ref[...].astype(jnp.float32), eps)
    y = _mxu_dot(xn.astype(x_ref.dtype), wt_ref[...], mxu_bf16)
    y = y + b_ref[...].astype(jnp.float32)
    # Dropout(p=0.0) / eval mode -> identity.
    o_ref[...] = jnp.maximum(y, 0.0).astype(o_ref.dtype)


def _kernel_norm_streamed(x_ref, wt_ref, b_ref, g_ref, beta_ref, o_ref, xn_ref,
                          *, eps, mxu_bf16):
    """LayerNorm once per row tile (cached in VMEM scratch), reused across j tiles."""
    @pl.when(pl.program_id(1) == 0)
    def _():
        xn = _layernorm_f32(x_ref[...].astype(jnp.float32),
                            g_ref[...].astype(jnp.float32),
                            beta_ref[...].astype(jnp.float32), eps)
        xn_ref[...] = xn.astype(xn_ref.dtype)
    y = _mxu_dot(xn_ref[...], wt_ref[...], mxu_bf16)
    y = y + b_ref[...].astype(jnp.float32)
    o_ref[...] = jnp.maximum(y, 0.0).astype(o_ref.dtype)


def prepare_linear_block_params(weight, bias, gamma=None, beta=None, *, norm=False):
    """One-time (init-time) layout work: transpose torch (out_len, in_len) weight to
    (in_len, out_len) and pad out_len up to a lane multiple so kernel output stores
    are lane-dense.  Hoisting this here removes per-forward HBM transpose/pad copies."""
    out_len, in_len = weight.shape
    np_ = _round_up(out_len, 128)
    wt = jnp.transpose(weight)                     # (in_len, out_len)
    if np_ != out_len:
        wt = jnp.pad(wt, ((0, 0), (0, np_ - out_len)))   # zero columns are inert
        bias = jnp.pad(bias, (0, np_ - out_len))
    params = dict(wt=wt, bias=bias.reshape(1, np_), in_len=in_len,
                  out_len=out_len, padded_out=np_, norm=norm)
    if norm:
        assert gamma is not None and beta is not None
        params["gamma"] = gamma.reshape(1, in_len)
        params["beta"] = beta.reshape(1, in_len)
    return params


def linear_block_forward(x, params, *, eps=1e-5, tm=None, tn=256,
                         mxu_bf16=False, prefer_resident_weight=True):
    """x: (N, C, in_len) -> relu(dropout(linear(norm(x)))) of shape (N, C, out_len).

    TODO(synk): training-mode dropout with p > 0 would need pltpu.prng_* in-kernel.
    """
    N, C, L = x.shape
    assert L == params["in_len"], "in_len mismatch"
    out_len, Np, norm = params["out_len"], params["padded_out"], params["norm"]
    M = N * C

    x2 = x.reshape(M, L)                 # no in_len padding; block uses full L
    wt, b2 = params["wt"], params["bias"]

    x_isz = jnp.dtype(x.dtype).itemsize
    w_isz = jnp.dtype(wt.dtype).itemsize
    o_isz = x_isz
    op_dtype = jnp.bfloat16 if (mxu_bf16 and x.dtype == jnp.float32) else x.dtype
    op_isz = jnp.dtype(op_dtype).itemsize

    # ---- generation-aware VMEM budget ----
    vmem_cap = _vmem_capacity_bytes()
    vmem_ceiling = min(int(0.80 * vmem_cap), 100 * 1024 * 1024)   # ~51 MiB on v7x

    # ---- row tiling ----
    row_align = 16 if x_isz < 4 else 8        # bf16 sublane packing
    if tm is None:
        # bigger row tiles amortize per-step overhead on 128 MiB chips (v6e)
        tm = 512 if (vmem_cap >= 100 * 1024 * 1024 and M >= 4096) else 256
    tm = min(tm, M)
    if tm < M:
        tm = max(row_align, (tm // row_align) * row_align)

    # ---- path selection: resident weight vs streamed column tiles ----
    resident_w_bytes = L * Np * w_isz
    est_resident = (2 * tm * L * x_isz        # x (double-buffered)
                    + 2 * resident_w_bytes    # weight (pessimistic 2 bufs)
                    + 2 * Np * w_isz          # bias
                    + 2 * tm * Np * o_isz     # output tile
                    + tm * Np * 4             # f32 matmul result headroom
                    + tm * L * 4              # LN intermediates headroom
                    + 4 * L * 4)              # gamma/beta
    use_resident = (prefer_resident_weight
                    and resident_w_bytes <= 8 * 1024 * 1024
                    and est_resident <= vmem_ceiling)

    if use_resident and pl.cdiv(M, tm) < 2 and M >= 2 * row_align:
        # v7x megacore: give both TensorCores a row tile.  Only done on the
        # resident path, where the weight is not re-streamed, so the only cost
        # elsewhere is one extra ~0.35us grid step.
        tm = _round_up(pl.cdiv(M, 2), row_align)
    grid_i = pl.cdiv(M, tm)

    if use_resident:
        grid = (grid_i,)
        in_specs = [
            pl.BlockSpec((tm, L), lambda i: (i, 0)),
            pl.BlockSpec((L, Np), lambda i: (0, 0)),    # resident: fetched once
            pl.BlockSpec((1, Np), lambda i: (0, 0)),
        ]
        args = [x2, wt, b2]
        scratch_shapes = ()
        if norm:
            in_specs += [pl.BlockSpec((1, L), lambda i: (0, 0)),
                         pl.BlockSpec((1, L), lambda i: (0, 0))]
            args += [params["gamma"], params["beta"]]
            kernel = functools.partial(_kernel_norm_resident, eps=eps, mxu_bf16=mxu_bf16)
        else:
            kernel = functools.partial(_kernel_nonorm, mxu_bf16=mxu_bf16)
        out_specs = pl.BlockSpec((tm, Np), lambda i: (i, 0))
        dims = ("parallel",)
        vmem_est = est_resident
        weight_streams = 1
    else:
        tn = max(128, (min(tn, Np) // 128) * 128)
        grid = (grid_i, pl.cdiv(Np, tn))
        in_specs = [
            pl.BlockSpec((tm, L), lambda i, j: (i, 0)),   # constant over j: 1 DMA / row tile
            pl.BlockSpec((L, tn), lambda i, j: (0, j)),
            pl.BlockSpec((1, tn), lambda i, j: (0, j)),
        ]
        args = [x2, wt, b2]
        scratch_shapes = ()
        if norm:
            in_specs += [pl.BlockSpec((1, L), lambda i, j: (0, 0)),
                         pl.BlockSpec((1, L), lambda i, j: (0, 0))]
            args += [params["gamma"], params["beta"]]
            scratch_shapes = (pltpu.VMEM((tm, L), op_dtype),)   # LN cache reused over j
            kernel = functools.partial(_kernel_norm_streamed, eps=eps, mxu_bf16=mxu_bf16)
        else:
            kernel = functools.partial(_kernel_nonorm, mxu_bf16=mxu_bf16)
        out_specs = pl.BlockSpec((tm, tn), lambda i, j: (i, j))
        dims = ("parallel", "arbitrary")      # j carries the LN scratch per row tile
        vmem_est = (2 * tm * L * x_isz + 2 * L * tn * w_isz + 2 * tn * w_isz
                    + 2 * tm * tn * o_isz + tm * tn * 4 + tm * L * (op_isz + 4)
                    + 4 * L * 4)
        weight_streams = grid_i

    vmem_limit = int(min(max(2 * vmem_est, 32 * 1024 * 1024), vmem_ceiling))

    cost = pl.CostEstimate(
        flops=2 * M * L * Np + (8 * M * L if norm else 0),
        transcendentals=M if norm else 0,
        bytes_accessed=int(M * L * x_isz
                           + weight_streams * (L * Np * w_isz + Np * w_isz)
                           + M * Np * o_isz
                           + (2 * L * w_isz if norm else 0)),
    )

    out = pl.pallas_call(
        kernel,
        out_shape=jax.ShapeDtypeStruct((M, Np), x.dtype),
        grid_spec=pltpu.PrefetchScalarGridSpec(
            num_scalar_prefetch=0,
            grid=grid,
            in_specs=in_specs,
            out_specs=out_specs,
            scratch_shapes=scratch_shapes,
        ),
        compiler_params=pltpu.CompilerParams(
            dimension_semantics=dims,
            vmem_limit_bytes=vmem_limit,
        ),
        cost_estimate=cost,
    )(*args)

    if Np != out_len:
        out = out[:, :out_len]
    return out.reshape(N, C, out_len)


def _reference(x, weight, bias, gamma, beta, *, norm=False, eps=1e-5):
    xf = x.astype(jnp.float32)
    if norm:
        mean = jnp.mean(xf, axis=-1, keepdims=True)
        var = jnp.mean(jnp.square(xf - mean), axis=-1, keepdims=True)
        xf = (xf - mean) / jnp.sqrt(var + eps)
        xf = xf * gamma.astype(jnp.float32) + beta.astype(jnp.float32)
    y = xf @ weight.astype(jnp.float32).T + bias.astype(jnp.float32)
    return jnp.maximum(y, 0.0).astype(x.dtype)


if __name__ == "__main__":
    key = jax.random.PRNGKey(0)
    kx, kw, kb, kg, kbe = jax.random.split(key, 5)

    def run_case(N, C, in_len, out_len, dtype, norm, tol, **fwd_kwargs):
        x = jax.random.normal(kx, (N, C, in_len), jnp.float32).astype(dtype)
        bound = 1.0 / (in_len ** 0.5)
        weight = jax.random.uniform(kw, (out_len, in_len), jnp.float32,
                                    -bound, bound).astype(dtype)
        bias = jax.random.uniform(kb, (out_len,), jnp.float32,
                                  -bound, bound).astype(dtype)
        gamma = (1.0 + 0.1 * jax.random.normal(kg, (in_len,), jnp.float32)).astype(dtype)
        beta = (0.1 * jax.random.normal(kbe, (in_len,), jnp.float32)).astype(dtype)

        params = prepare_linear_block_params(
            weight, bias, gamma if norm else None, beta if norm else None, norm=norm)
        out = linear_block_forward(x, params, **fwd_kwargs)
        out = jax.block_until_ready(out)
        assert out.shape == (N, C, out_len)

        ref = _reference(x, weight, bias, gamma, beta, norm=norm)
        return bool(jnp.allclose(out.astype(jnp.float32), ref.astype(jnp.float32),
                                 atol=tol, rtol=tol))

    ok = True
    # Default LinearBlock (norm=False), tiny shape -> resident-weight fast path.
    ok &= run_case(2, 4, 32, 64, jnp.float32, False, 1e-5)
    # norm=True path, resident weight.
    ok &= run_case(2, 4, 32, 64, jnp.float32, True, 1e-5)
    # Multi-row-tile grid, non-multiple-of-128 out_len (padded to Np), resident weight.
    ok &= run_case(3, 100, 96, 200, jnp.float32, True, 1e-4)
    # Force the streamed-weight path: 2-D grid, LN cached in VMEM scratch over j tiles.
    ok &= run_case(3, 100, 96, 300, jnp.float32, True, 1e-4,
                   prefer_resident_weight=False, tn=128)
    # bf16 operands (narrow MXU inputs, 16-row alignment), looser tolerance.
    ok &= run_case(2, 4, 32, 64, jnp.bfloat16, True, 5e-2)

    if ok:
        print("KERNEL_OK")
</pallas_src>

<mosaic_0001>
module attributes {stable_mosaic.version = 11 : i64} {
  func.func @_kernel_nonorm(%arg0: i32, %arg1: memref<8x32xf32, #tpu.memory_space<vmem>>, %arg2: memref<32x128xf32, #tpu.memory_space<vmem>>, %arg3: memref<1x128xf32, #tpu.memory_space<vmem>>, %arg4: memref<8x128xf32, #tpu.memory_space<vmem>>) attributes {dimension_semantics = [#tpu.dimension_semantics<parallel>], iteration_bounds = array<i64: 1>, scalar_prefetch = 0 : i64, scratch_operands = 0 : i64, tpu.core_type = #tpu.core_type<tc>, window_params = [{transform_indices = @transform_0, window_bounds = array<i64: 8, 32>}, {pipeline_mode = #tpu.pipeline_mode<synchronous>, transform_indices = @transform_1, window_bounds = array<i64: 32, 128>}, {pipeline_mode = #tpu.pipeline_mode<synchronous>, transform_indices = @transform_2, window_bounds = array<i64: 1, 128>}, {transform_indices = @transform_3, window_bounds = array<i64: 8, 128>}]} {
    %c0 = arith.constant 0 : index
    %c0_0 = arith.constant 0 : index
    %0 = vector.load %arg1[%c0, %c0_0] : memref<8x32xf32, #tpu.memory_space<vmem>>, vector<8x32xf32>
    %c0_1 = arith.constant 0 : index
    %c0_2 = arith.constant 0 : index
    %1 = vector.load %arg2[%c0_1, %c0_2] : memref<32x128xf32, #tpu.memory_space<vmem>>, vector<32x128xf32>
    %cst = arith.constant dense<0.000000e+00> : vector<8x128xf32>
    %2 = tpu.matmul %0, %1, %cst {dimension_numbers = #tpu.dot_dimension_numbers<[1], [0], [0], [1], [0, 0, 1, 1], [], []>} : vector<8x32xf32>, vector<32x128xf32>, vector<8x128xf32> -> vector<8x128xf32>
    %c0_3 = arith.constant 0 : index
    %c0_4 = arith.constant 0 : index
    %3 = vector.load %arg3[%c0_3, %c0_4] : memref<1x128xf32, #tpu.memory_space<vmem>>, vector<1x128xf32>
    %4 = vector.broadcast %3 : vector<1x128xf32> to vector<8x128xf32>
    %5 = arith.addf %2, %4 : vector<8x128xf32>
    %cst_5 = arith.constant 0.000000e+00 : f32
    %6 = vector.broadcast %cst_5 : f32 to vector<8x128xf32>
    %7 = arith.maximumf %5, %6 : vector<8x128xf32>
    %c0_6 = arith.constant 0 : index
    %c0_7 = arith.constant 0 : index
    %8 = vector.load %arg4[%c0_6, %c0_7] : memref<8x128xf32, #tpu.memory_space<vmem>>, vector<8x128xf32>
    tpu.vector_store %arg4[%c0_6, %c0_7], %7 {strides = array<i32>} : memref<8x128xf32, #tpu.memory_space<vmem>>, vector<8x128xf32>,
    return
  }
  func.func @transform_0(%arg0: i32) -> (i32, i32) {
    %c0_i32 = arith.constant 0 : i32
    %c0_i32_0 = arith.constant 0 : i32
    return %arg0, %c0_i32 : i32, i32
  }
  func.func @transform_1(%arg0: i32) -> (i32, i32) {
    %c0_i32 = arith.constant 0 : i32
    %c0_i32_0 = arith.constant 0 : i32
    %c0_i32_1 = arith.constant 0 : i32
    return %c0_i32, %c0_i32_0 : i32, i32
  }
  func.func @transform_2(%arg0: i32) -> (i32, i32) {
    %c0_i32 = arith.constant 0 : i32
    %c0_i32_0 = arith.constant 0 : i32
    %c0_i32_1 = arith.constant 0 : i32
    return %c0_i32, %c0_i32_0 : i32, i32
  }
  func.func @transform_3(%arg0: i32) -> (i32, i32) {
    %c0_i32 = arith.constant 0 : i32
    %c0_i32_0 = arith.constant 0 : i32
    return %arg0, %c0_i32 : i32, i32
  }
}

</mosaic_0001>

<bundles_post_ra>
// kernel: tpu_custom_call.1
= control target key start
LH: loop header
LB: loop body
LE: loop exit
PB: predicated region body
PF: predicated region fallthrough
CT: control target
= control target key end

     0   :  { %8 = vsyncpa [#allocation3], 0  ;;  %s323_s0 = inlined_call_operand.hbm [shape: f32[8,32], index: 0, kind: input, shape index: {}]   ;;  %s324_s1 = inlined_call_operand.hbm [shape: f32[32,128], index: 1, kind: input, shape index: {}]   ;;  %s325_s2 = inlined_call_operand.vmem [shape: f32[1,128], index: 2, kind: input, shape index: {}]   ;;  %s326_s3 = inlined_call_operand.hbm [shape: f32[8,128], index: 3, kind: output, shape index: {}]  }
   0x1   :  { %9 = vsyncpa [#allocation6], 0 }
   0x2   :  { %10 = vsyncpa [#allocation4], 0  ;;  %s249_s12 = smov [#allocation2]   ;;  %s250_s14 = smov [#allocation5]  }
   0x3   :  { %s17_s13 = sshll.u32 %s249_s12, 4  ;;  %s26_s15 = sshll.u32 %s250_s14, 4  ;;  %s18_s13 = int_to_ptr.vmem [resolvable:$true] %s17_s13  ;;  %s277_s15 = int_to_ptr.vmem [resolvable:$true] %s26_s15 }
   0x4   :  { %s177_s18 = scalar_lea.hbm %s323_s0, 128 }
   0x5   :  { %p178_p0 = scmp.ne.s32.totalorder %s323_s0, %s177_s18  ;;  %p181_p1 = scmp.lt.u32.totalorder %s177_s18, %s323_s0 }
   0x7   :  { %p183_p2 = pnand %p181_p1, %p178_p0 }
   0x9   :  { %186 = shalt.err (!%p183_p2)
}
   0xa   :  { %s187_s23 = scalar_lea.vmem %s18_s13, 128  ;;  %p192_p4 = scmp.lt.s32.totalorder %s18_s13, %s18_s13 }
   0xb   :  { %p188_p3 = scmp.ne.s32.totalorder %s18_s13, %s187_s23  ;;  %p193_p5 = scmp.lt.s32.totalorder %s187_s23, %s187_s23 }
   0xd   :  { %p194_p6 = por %p193_p5, %p192_p4 }
   0xf   :  { %p195_p7 = pnand %p194_p6, %p188_p3 }
  0x11   :  { %198 = shalt.err (!%p195_p7)
}
  0x12   :  { %20 = dma.hbm_to_vmem [thread:$0]  %s323_s0, 128, %s18_s13, [#allocation3]  }
  0x13   :  { %s199_s28 = scalar_lea.hbm %s324_s1, 512 }
  0x14   :  { %p200_p8 = scmp.ne.s32.totalorder %s324_s1, %s199_s28  ;;  %p203_p9 = scmp.lt.u32.totalorder %s199_s28, %s324_s1 }
  0x16   :  { %p205_p10 = pnand %p203_p9, %p200_p8 }
  0x18   :  { %208 = shalt.err (!%p205_p10)
}
  0x19   :  { %s209_s6 = scalar_lea.vmem %s277_s15, 512  ;;  %p214_p12 = scmp.lt.s32.totalorder %s277_s15, %s277_s15 }
  0x1a   :  { %p210_p11 = scmp.ne.s32.totalorder %s277_s15, %s209_s6  ;;  %p215_p13 = scmp.lt.s32.totalorder %s209_s6, %s209_s6 }
  0x1c   :  { %p216_p0 = por %p215_p13, %p214_p12 }
  0x1e   :  { %p217_p1 = pnand %p216_p0, %p210_p11 }
  0x20   :  { %220 = shalt.err (!%p217_p1)
}
  0x21   :  { %s251_s0 = smov 128   ;;  %s252_s7 = smov 8  }
  0x22   :  { %32 = dma.hbm_to_vmem [thread:$0]  %s324_s1, 512, %s277_s15, [#allocation6], %s251_s0, %s251_s0, %s252_s7  }
  0x23   :  { %243 = dma.done.wait [#allocation3], 128  }
  0x24   :  { %244 = vsyncadd [#allocation3], 4294967168 }
  0x25   :  { %245 = dma.done.wait [#allocation6], 512  }
  0x26   :  { %246 = vsyncadd [#allocation6], 4294966784  ;;  %v253_v0 = vmov 0.0|0.0   ;;  %vm254_vm0 = vmmov 0   ;;  %v255_v1 = vmov 0.0   ;;  %v42_v2 = vld [vmem:[#allocation5] sm:$0xff] }
  0x27   :  { %163 = vmatprep.subr.bf16.mxu0 %v253_v0  ;;  %160 = vmatprep.mubr.msk.f32.mxu0 %vm254_vm0, %v255_v1  ;;  %v43_v3 = vld [vmem:[#allocation5 + $0x8] sm:$0xff]  ;;  %v44_v4 = vld [vmem:[#allocation5 + $0x10] sm:$0xff]  ;;  %v45_v6 = vld [vmem:[#allocation5 + $0x18] sm:$0xff]  ;;  %vm53_vm1 = vcmask 261120   ;;  %s256_s11 = smov [#allocation7]  }
  0x28   :  { %v164_v5 = vpack.c.bf16 %v43_v3, %v42_v2  ;;  %v167_v7 = vpack.c.bf16 %v45_v6, %v44_v4  ;;  %v41_v8 = vld [vmem:[#allocation2] sm:$0xff]  ;;  %s135_s12 = sshll.u32 %s256_s11, 4  ;;  %s136_s12 = int_to_ptr.vmem [resolvable:$true] %s135_s12 }
  0x29   :  { %v145_v9 = vld [vmem:[%s325_s2] ss:$0 sm:$0xff]  ;;  %s221_s13 = scalar_lea.vmem %s136_s12, 128  ;;  %p226_p3 = scmp.lt.s32.totalorder %s136_s12, %s136_s12 }
  0x2a   :  { %165 = vmatpush3.bf16.msra.mxu0 %v164_v5  ;;  %p222_p2 = scmp.ne.s32.totalorder %s136_s12, %s221_s13  ;;  %p227_p4 = scmp.lt.s32.totalorder %s221_s13, %s221_s13 }
  0x2b   :  { %166 = vmatprep.subr.bf16.mxu0 %v253_v0 }
  0x2c   :  { %p228_p5 = por %p227_p4, %p226_p3 }
  0x2e   :  { %168 = vmatpush3.bf16.msra.mxu0 %v167_v7  ;;  %p229_p6 = pnand %p228_p5, %p222_p2 }
  0x31   :  { %161 = vmatmul.mubr.msk.f32.vlgmr.msra.gmra.mrb[0].mxu0 %vm53_vm1, %v41_v8 }
 0x104   :  { %v123_v10 = vpop.f32.mrb[0].mxu0 }
 0x105   :  { %v124_v11 = vadd.f32 %v145_v9, %v123_v10  ;;  %v162_v12 = vpop.f32.mrb[1].mxu0 }
 0x107   :  { %v127_v13 = vmax.f32 %v124_v11, 0.0 }
 0x109   :  { %128 = vst [vmem:[#allocation7] sm:$0xff] %v127_v13 }
 0x10a   :  { %232 = shalt.err (!%p229_p6)
}
 0x10b   :  { %s233_s16 = scalar_lea.hbm %s326_s3, 128 }
 0x10c   :  { %p234_p7 = scmp.ne.s32.totalorder %s326_s3, %s233_s16  ;;  %p237_p8 = scmp.lt.u32.totalorder %s233_s16, %s326_s3 }
 0x10e   :  { %p239_p9 = pnand %p237_p8, %p234_p7 }
 0x110   :  { %242 = shalt.err (!%p239_p9)
}
 0x111   :  { %138 = dma.vmem_to_hbm [thread:$0]  %s136_s12, 128, %s326_s3, [#allocation4]  }
 0x112   :  { %247 = dma.done.wait [#allocation4], 128  }
 0x113   :  { %248 = vsyncadd [#allocation4], 4294967168 }
 0x114   :  { %142 = vsyncpa [#allocation3], 1 }
 0x115   :  { %143 = vsyncpa [#allocation6], 1 }
 0x116   :  { %144 = vsyncpa [#allocation4], 1 }

</bundles_post_ra>
